<compile_context>
chip_gen: v5e
topology: v5e:2x2
jax: 0.10.0
libtpu: 0.0.40
codegen_flags: <defaults>
</compile_context>

<pallas_src>
import functools

import jax
import jax.numpy as jnp
from jax import lax
from jax.experimental import pallas as pl
from jax.experimental.pallas import tpu as pltpu

BN_EPS = 1e-5


def _conv_bn_relu_kernel(width, count, bn_eps,
                         x_ref, w_ref, g_ref, beta_ref, o_ref,
                         sum_sc, ssq_sc):
    # x_ref:    (1, Cin, P)     H-padded + flattened image, bf16, P=(H+2)*W+2
    # w_ref:    (9, Cout, Cin)  conv weight, tap-major (t = di*3 + dj), bf16
    # g_ref:    (Cout, 1)       BN gamma, f32
    # beta_ref: (Cout, 1)       BN beta, f32
    # o_ref:    (1, Cout, HW)   output block (NCHW flattened), f32
    # sum_sc / ssq_sc: (Cout,1) f32 scratch; per-channel running sum / sumsq,
    #                  reused to carry (scale, shift) into phase 1.
    phase = pl.program_id(0)          # 0 = stats pass, 1 = normalize pass
    i = pl.program_id(1)              # batch sample
    i_last = pl.num_programs(1) - 1

    cout = o_ref.shape[1]
    hw = o_ref.shape[2]

    # ---- conv: y[co, m] = sum_{ci,di,dj} W[co,ci,di,dj] * xpad[ci, h+di, w+dj]
    xb = x_ref[0]                                            # (Cin, P) bf16
    lane = lax.broadcasted_iota(jnp.int32, (1, hw), 1)
    col = lane % width
    not_first_col = col != 0                                 # mask for dj == 0
    not_last_col = col != (width - 1)                        # mask for dj == 2

    y = jnp.zeros((cout, hw), dtype=jnp.float32)
    for di in range(3):
        for dj in range(3):
            off = di * width + dj                            # constant lane offset
            xt = xb[:, off:off + hw]                         # (Cin, HW) shifted view
            wt = w_ref[di * 3 + dj]                          # (Cout, Cin)
            c = jnp.dot(wt, xt, preferred_element_type=jnp.float32)
            if dj == 0:                                      # emulate left W zero-pad
                c = jnp.where(not_first_col, c, 0.0)
            elif dj == 2:                                    # emulate right W zero-pad
                c = jnp.where(not_last_col, c, 0.0)
            y = y + c
    # (conv bias omitted: it cancels exactly under training-mode BN.)

    # ---- phase 0: accumulate per-channel batch statistics (single pass).
    @pl.when(jnp.logical_and(phase == 0, i == 0))
    def _init():
        sum_sc[...] = jnp.zeros_like(sum_sc)
        ssq_sc[...] = jnp.zeros_like(ssq_sc)

    @pl.when(phase == 0)
    def _accumulate():
        sum_sc[...] += jnp.sum(y, axis=1, keepdims=True)
        ssq_sc[...] += jnp.sum(y * y, axis=1, keepdims=True)

    @pl.when(jnp.logical_and(phase == 0, i == i_last))
    def _finalize():
        inv_cnt = jnp.float32(1.0 / count)
        mean = sum_sc[...] * inv_cnt
        var = ssq_sc[...] * inv_cnt - mean * mean            # biased (train-mode BN)
        inv_std = lax.rsqrt(var + bn_eps)
        scale = g_ref[...] * inv_std
        sum_sc[...] = scale                                  # carry into phase 1
        ssq_sc[...] = beta_ref[...] - mean * scale

    # ---- phase 1: normalize + ReLU; lane-dense store (last dim = H*W >= 128).
    @pl.when(phase == 1)
    def _apply():
        o_ref[0] = jnp.maximum(y * sum_sc[...] + ssq_sc[...], 0.0).astype(o_ref.dtype)


@functools.partial(jax.jit, static_argnames=("stride",))
def basic_block_forward(x_nchw, conv_w, conv_b, bn_gamma, bn_beta, *, stride=1):
    """x_nchw: (N, Cin, H, W); conv_w: (Cout, Cin, 3, 3). Returns NCHW f32."""
    del conv_b  # exactly cancelled by training-mode BN mean subtraction
    if stride != 1:
        # TODO(synk): stride != 1 not supported by the fused stride-1 fast path.
        raise NotImplementedError("Pallas BasicBlock kernel implements stride=1 only.")

    n, cin, h, w = x_nchw.shape
    cout = conv_w.shape[0]
    hw = h * w
    p_len = (h + 2) * w + 2

    # H-only zero pad + flatten spatial dims (W padding is emulated in-kernel
    # with lane masks so every 3x3 tap is a constant-offset slice); the +-1
    # guard elements keep all tap slices in range. Layout stays NCHW.
    xh = jnp.pad(x_nchw.astype(jnp.float32), ((0, 0), (0, 0), (1, 1), (0, 0)))
    xf = jnp.pad(xh.reshape(n, cin, (h + 2) * w), ((0, 0), (0, 0), (1, 1)))
    xf = xf.astype(jnp.bfloat16)                              # (N, Cin, P)

    # (Cout, Cin, 3, 3) -> (3, 3, Cout, Cin) -> (9, Cout, Cin), tap-major.
    w_taps = jnp.transpose(conv_w, (2, 3, 0, 1)).reshape(9, cout, cin)
    w_taps = w_taps.astype(jnp.bfloat16)
    gamma = bn_gamma.reshape(cout, 1).astype(jnp.float32)
    beta = bn_beta.reshape(cout, 1).astype(jnp.float32)

    kernel = functools.partial(_conv_bn_relu_kernel, w, n * hw, BN_EPS)

    out_flat = pl.pallas_call(
        kernel,
        out_shape=jax.ShapeDtypeStruct((n, cout, hw), jnp.float32),
        grid=(2, n),                                 # (phase, batch); phase outer
        in_specs=[
            pl.BlockSpec((1, cin, p_len), lambda p, i: (i, 0, 0)),   # per-sample x
            pl.BlockSpec((9, cout, cin), lambda p, i: (0, 0, 0)),    # resident weights
            pl.BlockSpec((cout, 1), lambda p, i: (0, 0)),            # resident gamma
            pl.BlockSpec((cout, 1), lambda p, i: (0, 0)),            # resident beta
        ],
        # Phase 0 never writes the output: pin the out block index at 0 during
        # phase 0 so no garbage writebacks happen; phase 1 then walks the
        # samples and each block is flushed exactly once after being written.
        out_specs=pl.BlockSpec((1, cout, hw), lambda p, i: (p * i, 0, 0)),
        scratch_shapes=[
            pltpu.VMEM((cout, 1), jnp.float32),      # per-channel sum   -> scale
            pltpu.VMEM((cout, 1), jnp.float32),      # per-channel sumsq -> shift
        ],
        compiler_params=pltpu.CompilerParams(
            # Both axes carry sequential dependencies (cross-sample BN
            # reduction; stats must finish before the normalize pass), so
            # neither axis may be marked "parallel".
            dimension_semantics=("arbitrary", "arbitrary"),
        ),
    )(xf, w_taps, gamma, beta)

    return out_flat.reshape(n, cout, h, w)           # already NCHW; reshape is free


def _reference(x_nchw, conv_w, conv_b, bn_gamma, bn_beta, stride):
    # Round the conv operands to bf16 like the kernel's MXU path so the
    # comparison isolates kernel correctness (both accumulate in f32).
    xq = x_nchw.astype(jnp.bfloat16).astype(jnp.float32)
    wq = conv_w.astype(jnp.bfloat16).astype(jnp.float32)
    y = lax.conv_general_dilated(
        xq, wq, window_strides=(stride, stride), padding=((1, 1), (1, 1)),
        dimension_numbers=("NCHW", "OIHW", "NCHW"))
    y = y + conv_b.reshape(1, -1, 1, 1)
    mean = jnp.mean(y, axis=(0, 2, 3), keepdims=True)
    var = jnp.mean((y - mean) ** 2, axis=(0, 2, 3), keepdims=True)
    yn = (y - mean) * lax.rsqrt(var + BN_EPS)
    yn = yn * bn_gamma.reshape(1, -1, 1, 1) + bn_beta.reshape(1, -1, 1, 1)
    return jnp.maximum(yn, 0.0)


if __name__ == "__main__":
    # BasicBlock('Conv', inplane=4, outplane=8, stride=1)
    N, CIN, COUT, H, W, STRIDE = 2, 4, 8, 16, 16, 1

    key = jax.random.PRNGKey(0)
    kx, kw, kb = jax.random.split(key, 3)
    x = jax.random.normal(kx, (N, CIN, H, W), dtype=jnp.float32)

    # Deterministic parameter init (kaiming-uniform-like bound, like nn.Conv2d).
    fan_in = CIN * 3 * 3
    bound = 1.0 / (fan_in ** 0.5)
    conv_w = jax.random.uniform(kw, (COUT, CIN, 3, 3), jnp.float32, -bound, bound)
    conv_b = jax.random.uniform(kb, (COUT,), jnp.float32, -bound, bound)
    bn_gamma = jnp.ones((COUT,), jnp.float32)   # nn.BatchNorm2d default weight
    bn_beta = jnp.zeros((COUT,), jnp.float32)   # nn.BatchNorm2d default bias

    out = basic_block_forward(x, conv_w, conv_b, bn_gamma, bn_beta, stride=STRIDE)
    out = jax.block_until_ready(out)

    ref = _reference(x, conv_w, conv_b, bn_gamma, bn_beta, STRIDE)
    assert out.shape == (N, COUT, H // STRIDE, W // STRIDE), out.shape
    max_err = float(jnp.max(jnp.abs(out - ref)))
    assert jnp.allclose(out, ref, atol=1e-3, rtol=1e-3), max_err

    print("KERNEL_OK")
</pallas_src>

<mosaic_0001>
module attributes {stable_mosaic.version = 11 : i64} {
  func.func @_conv_bn_relu_kernel(%arg0: i32, %arg1: i32, %arg2: memref<1x4x290xbf16, #tpu.memory_space<vmem>>, %arg3: memref<9x8x4xbf16, #tpu.memory_space<vmem>>, %arg4: memref<8x1xf32, #tpu.memory_space<vmem>>, %arg5: memref<8x1xf32, #tpu.memory_space<vmem>>, %arg6: memref<1x8x256xf32, #tpu.memory_space<vmem>>, %arg7: memref<8x1xf32, #tpu.memory_space<vmem>>, %arg8: memref<8x1xf32, #tpu.memory_space<vmem>>) attributes {dimension_semantics = [#tpu.dimension_semantics<arbitrary>, #tpu.dimension_semantics<arbitrary>], iteration_bounds = array<i64: 2, 2>, scalar_prefetch = 0 : i64, scratch_operands = 2 : i64, tpu.core_type = #tpu.core_type<tc>, window_params = [{transform_indices = @transform_0, window_bounds = array<i64: 1, 4, 290>}, {pipeline_mode = #tpu.pipeline_mode<synchronous>, transform_indices = @transform_1, window_bounds = array<i64: 9, 8, 4>}, {pipeline_mode = #tpu.pipeline_mode<synchronous>, transform_indices = @transform_2, window_bounds = array<i64: 8, 1>}, {pipeline_mode = #tpu.pipeline_mode<synchronous>, transform_indices = @transform_3, window_bounds = array<i64: 8, 1>}, {transform_indices = @transform_4, window_bounds = array<i64: 1, 8, 256>}]} {
    %c0 = arith.constant 0 : index
    %c0_0 = arith.constant 0 : index
    %c0_1 = arith.constant 0 : index
    %0 = vector.load %arg2[%c0, %c0_0, %c0_1] : memref<1x4x290xbf16, #tpu.memory_space<vmem>>, vector<1x4x290xbf16>
    %1 = vector.shape_cast %0 : vector<1x4x290xbf16> to vector<4x290xbf16>
    %2 = tpu.iota {dimensions = array<i32: 1>} : vector<1x256xi32>
    %c16_i32 = arith.constant 16 : i32
    %c0_i32 = arith.constant 0 : i32
    %3 = arith.cmpi eq, %c16_i32, %c0_i32 : i32
    %c1_i32 = arith.constant 1 : i32
    %4 = arith.select %3, %c1_i32, %c16_i32 : i32
    %5 = vector.broadcast %4 : i32 to vector<1x256xi32>
    %6 = arith.remsi %2, %5 : vector<1x256xi32>
    %c0_i32_2 = arith.constant 0 : i32
    %7 = vector.broadcast %c0_i32_2 : i32 to vector<1x256xi32>
    %8 = arith.cmpi ne, %6, %7 : vector<1x256xi32>
    %c0_i32_3 = arith.constant 0 : i32
    %9 = vector.broadcast %c0_i32_3 : i32 to vector<1x256xi32>
    %10 = arith.cmpi slt, %6, %9 : vector<1x256xi32>
    %c0_i32_4 = arith.constant 0 : i32
    %11 = arith.cmpi slt, %4, %c0_i32_4 : i32
    %12 = vector.broadcast %11 : i1 to vector<1x256xi1>
    %13 = vector.broadcast %12 : vector<1x256xi1> to vector<1x256xi1>
    %14 = arith.xori %10, %13 : vector<1x256xi1>
    %15 = arith.andi %14, %8 : vector<1x256xi1>
    %16 = vector.broadcast %4 : i32 to vector<1x256xi32>
    %17 = arith.addi %6, %16 : vector<1x256xi32>
    %18 = arith.select %15, %17, %6 : vector<1x256xi1>, vector<1x256xi32>
    %c0_i32_5 = arith.constant 0 : i32
    %19 = vector.broadcast %c0_i32_5 : i32 to vector<1x256xi32>
    %20 = arith.cmpi ne, %18, %19 : vector<1x256xi32>
    %c15_i32 = arith.constant 15 : i32
    %21 = vector.broadcast %c15_i32 : i32 to vector<1x256xi32>
    %22 = arith.cmpi ne, %18, %21 : vector<1x256xi32>
    %cst = arith.constant 0.000000e+00 : f32
    %23 = vector.broadcast %cst : f32 to vector<8x256xf32>
    %24 = vector.extract_strided_slice %1 {offsets = [0, 0], sizes = [4, 256], strides = [1, 1]} : vector<4x290xbf16> to vector<4x256xbf16>
    %c0_6 = arith.constant 0 : index
    %c0_7 = arith.constant 0 : index
    %c0_8 = arith.constant 0 : index
    %25 = vector.load %arg3[%c0_6, %c0_7, %c0_8] : memref<9x8x4xbf16, #tpu.memory_space<vmem>>, vector<1x8x4xbf16>
    %26 = vector.shape_cast %25 : vector<1x8x4xbf16> to vector<8x4xbf16>
    %cst_9 = arith.constant dense<0.000000e+00> : vector<8x256xf32>
    %27 = tpu.matmul %26, %24, %cst_9 {dimension_numbers = #tpu.dot_dimension_numbers<[1], [0], [0], [1], [0, 0, 1, 1], [], []>} : vector<8x4xbf16>, vector<4x256xbf16>, vector<8x256xf32> -> vector<8x256xf32>
    %cst_10 = arith.constant 0.000000e+00 : f32
    %28 = vector.shape_cast %20 : vector<1x256xi1> to vector<1x256xi1>
    %29 = vector.broadcast %28 : vector<1x256xi1> to vector<8x256xi1>
    %30 = vector.broadcast %cst_10 : f32 to vector<8x256xf32>
    %31 = arith.select %29, %27, %30 : vector<8x256xi1>, vector<8x256xf32>
    %32 = arith.addf %23, %31 : vector<8x256xf32>
    %33 = vector.extract_strided_slice %1 {offsets = [0, 1], sizes = [4, 256], strides = [1, 1]} : vector<4x290xbf16> to vector<4x256xbf16>
    %c1 = arith.constant 1 : index
    %c0_11 = arith.constant 0 : index
    %c0_12 = arith.constant 0 : index
    %34 = vector.load %arg3[%c1, %c0_11, %c0_12] : memref<9x8x4xbf16, #tpu.memory_space<vmem>>, vector<1x8x4xbf16>
    %35 = vector.shape_cast %34 : vector<1x8x4xbf16> to vector<8x4xbf16>
    %cst_13 = arith.constant dense<0.000000e+00> : vector<8x256xf32>
    %36 = tpu.matmul %35, %33, %cst_13 {dimension_numbers = #tpu.dot_dimension_numbers<[1], [0], [0], [1], [0, 0, 1, 1], [], []>} : vector<8x4xbf16>, vector<4x256xbf16>, vector<8x256xf32> -> vector<8x256xf32>
    %37 = arith.addf %32, %36 : vector<8x256xf32>
    %38 = vector.extract_strided_slice %1 {offsets = [0, 2], sizes = [4, 256], strides = [1, 1]} : vector<4x290xbf16> to vector<4x256xbf16>
    %c2 = arith.constant 2 : index
    %c0_14 = arith.constant 0 : index
    %c0_15 = arith.constant 0 : index
    %39 = vector.load %arg3[%c2, %c0_14, %c0_15] : memref<9x8x4xbf16, #tpu.memory_space<vmem>>, vector<1x8x4xbf16>
    %40 = vector.shape_cast %39 : vector<1x8x4xbf16> to vector<8x4xbf16>
    %cst_16 = arith.constant dense<0.000000e+00> : vector<8x256xf32>
    %41 = tpu.matmul %40, %38, %cst_16 {dimension_numbers = #tpu.dot_dimension_numbers<[1], [0], [0], [1], [0, 0, 1, 1], [], []>} : vector<8x4xbf16>, vector<4x256xbf16>, vector<8x256xf32> -> vector<8x256xf32>
    %cst_17 = arith.constant 0.000000e+00 : f32
    %42 = vector.shape_cast %22 : vector<1x256xi1> to vector<1x256xi1>
    %43 = vector.broadcast %42 : vector<1x256xi1> to vector<8x256xi1>
    %44 = vector.broadcast %cst_17 : f32 to vector<8x256xf32>
    %45 = arith.select %43, %41, %44 : vector<8x256xi1>, vector<8x256xf32>
    %46 = arith.addf %37, %45 : vector<8x256xf32>
    %47 = vector.extract_strided_slice %1 {offsets = [0, 16], sizes = [4, 256], strides = [1, 1]} : vector<4x290xbf16> to vector<4x256xbf16>
    %c3 = arith.constant 3 : index
    %c0_18 = arith.constant 0 : index
    %c0_19 = arith.constant 0 : index
    %48 = vector.load %arg3[%c3, %c0_18, %c0_19] : memref<9x8x4xbf16, #tpu.memory_space<vmem>>, vector<1x8x4xbf16>
    %49 = vector.shape_cast %48 : vector<1x8x4xbf16> to vector<8x4xbf16>
    %cst_20 = arith.constant dense<0.000000e+00> : vector<8x256xf32>
    %50 = tpu.matmul %49, %47, %cst_20 {dimension_numbers = #tpu.dot_dimension_numbers<[1], [0], [0], [1], [0, 0, 1, 1], [], []>} : vector<8x4xbf16>, vector<4x256xbf16>, vector<8x256xf32> -> vector<8x256xf32>
    %cst_21 = arith.constant 0.000000e+00 : f32
    %51 = vector.shape_cast %20 : vector<1x256xi1> to vector<1x256xi1>
    %52 = vector.broadcast %51 : vector<1x256xi1> to vector<8x256xi1>
    %53 = vector.broadcast %cst_21 : f32 to vector<8x256xf32>
    %54 = arith.select %52, %50, %53 : vector<8x256xi1>, vector<8x256xf32>
    %55 = arith.addf %46, %54 : vector<8x256xf32>
    %56 = vector.extract_strided_slice %1 {offsets = [0, 17], sizes = [4, 256], strides = [1, 1]} : vector<4x290xbf16> to vector<4x256xbf16>
    %c4 = arith.constant 4 : index
    %c0_22 = arith.constant 0 : index
    %c0_23 = arith.constant 0 : index
    %57 = vector.load %arg3[%c4, %c0_22, %c0_23] : memref<9x8x4xbf16, #tpu.memory_space<vmem>>, vector<1x8x4xbf16>
    %58 = vector.shape_cast %57 : vector<1x8x4xbf16> to vector<8x4xbf16>
    %cst_24 = arith.constant dense<0.000000e+00> : vector<8x256xf32>
    %59 = tpu.matmul %58, %56, %cst_24 {dimension_numbers = #tpu.dot_dimension_numbers<[1], [0], [0], [1], [0, 0, 1, 1], [], []>} : vector<8x4xbf16>, vector<4x256xbf16>, vector<8x256xf32> -> vector<8x256xf32>
    %60 = arith.addf %55, %59 : vector<8x256xf32>
    %61 = vector.extract_strided_slice %1 {offsets = [0, 18], sizes = [4, 256], strides = [1, 1]} : vector<4x290xbf16> to vector<4x256xbf16>
    %c5 = arith.constant 5 : index
    %c0_25 = arith.constant 0 : index
    %c0_26 = arith.constant 0 : index
    %62 = vector.load %arg3[%c5, %c0_25, %c0_26] : memref<9x8x4xbf16, #tpu.memory_space<vmem>>, vector<1x8x4xbf16>
    %63 = vector.shape_cast %62 : vector<1x8x4xbf16> to vector<8x4xbf16>
    %cst_27 = arith.constant dense<0.000000e+00> : vector<8x256xf32>
    %64 = tpu.matmul %63, %61, %cst_27 {dimension_numbers = #tpu.dot_dimension_numbers<[1], [0], [0], [1], [0, 0, 1, 1], [], []>} : vector<8x4xbf16>, vector<4x256xbf16>, vector<8x256xf32> -> vector<8x256xf32>
    %cst_28 = arith.constant 0.000000e+00 : f32
    %65 = vector.shape_cast %22 : vector<1x256xi1> to vector<1x256xi1>
    %66 = vector.broadcast %65 : vector<1x256xi1> to vector<8x256xi1>
    %67 = vector.broadcast %cst_28 : f32 to vector<8x256xf32>
    %68 = arith.select %66, %64, %67 : vector<8x256xi1>, vector<8x256xf32>
    %69 = arith.addf %60, %68 : vector<8x256xf32>
    %70 = vector.extract_strided_slice %1 {offsets = [0, 32], sizes = [4, 256], strides = [1, 1]} : vector<4x290xbf16> to vector<4x256xbf16>
    %c6 = arith.constant 6 : index
    %c0_29 = arith.constant 0 : index
    %c0_30 = arith.constant 0 : index
    %71 = vector.load %arg3[%c6, %c0_29, %c0_30] : memref<9x8x4xbf16, #tpu.memory_space<vmem>>, vector<1x8x4xbf16>
    %72 = vector.shape_cast %71 : vector<1x8x4xbf16> to vector<8x4xbf16>
    %cst_31 = arith.constant dense<0.000000e+00> : vector<8x256xf32>
    %73 = tpu.matmul %72, %70, %cst_31 {dimension_numbers = #tpu.dot_dimension_numbers<[1], [0], [0], [1], [0, 0, 1, 1], [], []>} : vector<8x4xbf16>, vector<4x256xbf16>, vector<8x256xf32> -> vector<8x256xf32>
    %cst_32 = arith.constant 0.000000e+00 : f32
    %74 = vector.shape_cast %20 : vector<1x256xi1> to vector<1x256xi1>
    %75 = vector.broadcast %74 : vector<1x256xi1> to vector<8x256xi1>
    %76 = vector.broadcast %cst_32 : f32 to vector<8x256xf32>
    %77 = arith.select %75, %73, %76 : vector<8x256xi1>, vector<8x256xf32>
    %78 = arith.addf %69, %77 : vector<8x256xf32>
    %79 = vector.extract_strided_slice %1 {offsets = [0, 33], sizes = [4, 256], strides = [1, 1]} : vector<4x290xbf16> to vector<4x256xbf16>
    %c7 = arith.constant 7 : index
    %c0_33 = arith.constant 0 : index
    %c0_34 = arith.constant 0 : index
    %80 = vector.load %arg3[%c7, %c0_33, %c0_34] : memref<9x8x4xbf16, #tpu.memory_space<vmem>>, vector<1x8x4xbf16>
    %81 = vector.shape_cast %80 : vector<1x8x4xbf16> to vector<8x4xbf16>
    %cst_35 = arith.constant dense<0.000000e+00> : vector<8x256xf32>
    %82 = tpu.matmul %81, %79, %cst_35 {dimension_numbers = #tpu.dot_dimension_numbers<[1], [0], [0], [1], [0, 0, 1, 1], [], []>} : vector<8x4xbf16>, vector<4x256xbf16>, vector<8x256xf32> -> vector<8x256xf32>
    %83 = arith.addf %78, %82 : vector<8x256xf32>
    %84 = vector.extract_strided_slice %1 {offsets = [0, 34], sizes = [4, 256], strides = [1, 1]} : vector<4x290xbf16> to vector<4x256xbf16>
    %c8 = arith.constant 8 : index
    %c0_36 = arith.constant 0 : index
    %c0_37 = arith.constant 0 : index
    %85 = vector.load %arg3[%c8, %c0_36, %c0_37] : memref<9x8x4xbf16, #tpu.memory_space<vmem>>, vector<1x8x4xbf16>
    %86 = vector.shape_cast %85 : vector<1x8x4xbf16> to vector<8x4xbf16>
    %cst_38 = arith.constant dense<0.000000e+00> : vector<8x256xf32>
    %87 = tpu.matmul %86, %84, %cst_38 {dimension_numbers = #tpu.dot_dimension_numbers<[1], [0], [0], [1], [0, 0, 1, 1], [], []>} : vector<8x4xbf16>, vector<4x256xbf16>, vector<8x256xf32> -> vector<8x256xf32>
    %cst_39 = arith.constant 0.000000e+00 : f32
    %88 = vector.shape_cast %22 : vector<1x256xi1> to vector<1x256xi1>
    %89 = vector.broadcast %88 : vector<1x256xi1> to vector<8x256xi1>
    %90 = vector.broadcast %cst_39 : f32 to vector<8x256xf32>
    %91 = arith.select %89, %87, %90 : vector<8x256xi1>, vector<8x256xf32>
    %92 = arith.addf %83, %91 : vector<8x256xf32>
    %c0_i32_40 = arith.constant 0 : i32
    %93 = arith.cmpi eq, %arg0, %c0_i32_40 : i32
    %c0_i32_41 = arith.constant 0 : i32
    %94 = arith.cmpi eq, %arg1, %c0_i32_41 : i32
    %95 = arith.andi %93, %94 : i1
    %96 = arith.extui %95 : i1 to i32
    %c0_i32_42 = arith.constant 0 : i32
    %97 = arith.cmpi ne, %96, %c0_i32_42 : i32
    scf.if %97 {
      %cst_50 = arith.constant 0.000000e+00 : f32
      %109 = vector.broadcast %cst_50 : f32 to vector<8x1xf32>
      %c0_51 = arith.constant 0 : index
      %c0_52 = arith.constant 0 : index
      %110 = vector.load %arg7[%c0_51, %c0_52] : memref<8x1xf32, #tpu.memory_space<vmem>>, vector<8x1xf32>
      tpu.vector_store %arg7[%c0_51, %c0_52], %109 {strides = array<i32>} : memref<8x1xf32, #tpu.memory_space<vmem>>, vector<8x1xf32>,
      %cst_53 = arith.constant 0.000000e+00 : f32
      %111 = vector.broadcast %cst_53 : f32 to vector<8x1xf32>
      %c0_54 = arith.constant 0 : index
      %c0_55 = arith.constant 0 : index
      %112 = vector.load %arg8[%c0_54, %c0_55] : memref<8x1xf32, #tpu.memory_space<vmem>>, vector<8x1xf32>
      tpu.vector_store %arg8[%c0_54, %c0_55], %111 {strides = array<i32>} : memref<8x1xf32, #tpu.memory_space<vmem>>, vector<8x1xf32>,
    } else {
    }
    %c0_i32_43 = arith.constant 0 : i32
    %98 = arith.cmpi eq, %arg0, %c0_i32_43 : i32
    %99 = arith.extui %98 : i1 to i32
    %c0_i32_44 = arith.constant 0 : i32
    %100 = arith.cmpi ne, %99, %c0_i32_44 : i32
    scf.if %100 {
      %c0_50 = arith.constant 0 : index
      %c0_51 = arith.constant 0 : index
      %109 = vector.load %arg7[%c0_50, %c0_51] : memref<8x1xf32, #tpu.memory_space<vmem>>, vector<8x1xf32>
      %cst_52 = arith.constant dense<0.000000e+00> : vector<8xf32>
      %110 = vector.multi_reduction <add>, %92, %cst_52 [1] : vector<8x256xf32> to vector<8xf32>
      %111 = vector.shape_cast %110 : vector<8xf32> to vector<8x1xf32>
      %112 = arith.addf %109, %111 : vector<8x1xf32>
      %c0_53 = arith.constant 0 : index
      %c0_54 = arith.constant 0 : index
      %113 = vector.load %arg7[%c0_53, %c0_54] : memref<8x1xf32, #tpu.memory_space<vmem>>, vector<8x1xf32>
      tpu.vector_store %arg7[%c0_53, %c0_54], %112 {strides = array<i32>} : memref<8x1xf32, #tpu.memory_space<vmem>>, vector<8x1xf32>,
      %c0_55 = arith.constant 0 : index
      %c0_56 = arith.constant 0 : index
      %114 = vector.load %arg8[%c0_55, %c0_56] : memref<8x1xf32, #tpu.memory_space<vmem>>, vector<8x1xf32>
      %115 = arith.mulf %92, %92 : vector<8x256xf32>
      %cst_57 = arith.constant dense<0.000000e+00> : vector<8xf32>
      %116 = vector.multi_reduction <add>, %115, %cst_57 [1] : vector<8x256xf32> to vector<8xf32>
      %117 = vector.shape_cast %116 : vector<8xf32> to vector<8x1xf32>
      %118 = arith.addf %114, %117 : vector<8x1xf32>
      %c0_58 = arith.constant 0 : index
      %c0_59 = arith.constant 0 : index
      %119 = vector.load %arg8[%c0_58, %c0_59] : memref<8x1xf32, #tpu.memory_space<vmem>>, vector<8x1xf32>
      tpu.vector_store %arg8[%c0_58, %c0_59], %118 {strides = array<i32>} : memref<8x1xf32, #tpu.memory_space<vmem>>, vector<8x1xf32>,
    } else {
    }
    %c0_i32_45 = arith.constant 0 : i32
    %101 = arith.cmpi eq, %arg0, %c0_i32_45 : i32
    %c1_i32_46 = arith.constant 1 : i32
    %102 = arith.cmpi eq, %arg1, %c1_i32_46 : i32
    %103 = arith.andi %101, %102 : i1
    %104 = arith.extui %103 : i1 to i32
    %c0_i32_47 = arith.constant 0 : i32
    %105 = arith.cmpi ne, %104, %c0_i32_47 : i32
    scf.if %105 {
      %c0_50 = arith.constant 0 : index
      %c0_51 = arith.constant 0 : index
      %109 = vector.load %arg7[%c0_50, %c0_51] : memref<8x1xf32, #tpu.memory_space<vmem>>, vector<8x1xf32>
      %cst_52 = arith.constant 0.001953125 : f32
      %110 = vector.broadcast %cst_52 : f32 to vector<8x1xf32>
      %111 = arith.mulf %109, %110 : vector<8x1xf32>
      %c0_53 = arith.constant 0 : index
      %c0_54 = arith.constant 0 : index
      %112 = vector.load %arg8[%c0_53, %c0_54] : memref<8x1xf32, #tpu.memory_space<vmem>>, vector<8x1xf32>
      %cst_55 = arith.constant 0.001953125 : f32
      %113 = vector.broadcast %cst_55 : f32 to vector<8x1xf32>
      %114 = arith.mulf %112, %113 : vector<8x1xf32>
      %115 = arith.mulf %111, %111 : vector<8x1xf32>
      %116 = arith.subf %114, %115 : vector<8x1xf32>
      %cst_56 = arith.constant 9.99999974E-6 : f32
      %117 = vector.broadcast %cst_56 : f32 to vector<8x1xf32>
      %118 = arith.addf %116, %117 : vector<8x1xf32>
      %119 = math.rsqrt %118 : vector<8x1xf32>
      %c0_57 = arith.constant 0 : index
      %c0_58 = arith.constant 0 : index
      %120 = vector.load %arg4[%c0_57, %c0_58] : memref<8x1xf32, #tpu.memory_space<vmem>>, vector<8x1xf32>
      %121 = arith.mulf %120, %119 : vector<8x1xf32>
      %c0_59 = arith.constant 0 : index
      %c0_60 = arith.constant 0 : index
      %122 = vector.load %arg7[%c0_59, %c0_60] : memref<8x1xf32, #tpu.memory_space<vmem>>, vector<8x1xf32>
      tpu.vector_store %arg7[%c0_59, %c0_60], %121 {strides = array<i32>} : memref<8x1xf32, #tpu.memory_space<vmem>>, vector<8x1xf32>,
      %c0_61 = arith.constant 0 : index
      %c0_62 = arith.constant 0 : index
      %123 = vector.load %arg5[%c0_61, %c0_62] : memref<8x1xf32, #tpu.memory_space<vmem>>, vector<8x1xf32>
      %124 = arith.mulf %111, %121 : vector<8x1xf32>
      %125 = arith.subf %123, %124 : vector<8x1xf32>
      %c0_63 = arith.constant 0 : index
      %c0_64 = arith.constant 0 : index
      %126 = vector.load %arg8[%c0_63, %c0_64] : memref<8x1xf32, #tpu.memory_space<vmem>>, vector<8x1xf32>
      tpu.vector_store %arg8[%c0_63, %c0_64], %125 {strides = array<i32>} : memref<8x1xf32, #tpu.memory_space<vmem>>, vector<8x1xf32>,
    } else {
    }
    %c1_i32_48 = arith.constant 1 : i32
    %106 = arith.cmpi eq, %arg0, %c1_i32_48 : i32
    %107 = arith.extui %106 : i1 to i32
    %c0_i32_49 = arith.constant 0 : i32
    %108 = arith.cmpi ne, %107, %c0_i32_49 : i32
    scf.if %108 {
      %c0_50 = arith.constant 0 : index
      %c0_51 = arith.constant 0 : index
      %109 = vector.load %arg7[%c0_50, %c0_51] : memref<8x1xf32, #tpu.memory_space<vmem>>, vector<8x1xf32>
      %110 = vector.broadcast %109 : vector<8x1xf32> to vector<8x256xf32>
      %111 = arith.mulf %92, %110 : vector<8x256xf32>
      %c0_52 = arith.constant 0 : index
      %c0_53 = arith.constant 0 : index
      %112 = vector.load %arg8[%c0_52, %c0_53] : memref<8x1xf32, #tpu.memory_space<vmem>>, vector<8x1xf32>
      %113 = vector.broadcast %112 : vector<8x1xf32> to vector<8x256xf32>
      %114 = arith.addf %111, %113 : vector<8x256xf32>
      %cst_54 = arith.constant 0.000000e+00 : f32
      %115 = vector.broadcast %cst_54 : f32 to vector<8x256xf32>
      %116 = arith.maximumf %114, %115 : vector<8x256xf32>
      %c0_55 = arith.constant 0 : index
      %c0_56 = arith.constant 0 : index
      %c0_57 = arith.constant 0 : index
      %117 = vector.load %arg6[%c0_55, %c0_56, %c0_57] : memref<1x8x256xf32, #tpu.memory_space<vmem>>, vector<1x8x256xf32>
      %118 = vector.shape_cast %117 : vector<1x8x256xf32> to vector<8x256xf32>
      %119 = vector.shape_cast %116 : vector<8x256xf32> to vector<1x8x256xf32>
      tpu.vector_store %arg6[%c0_55, %c0_56, %c0_57], %119 {strides = array<i32>} : memref<1x8x256xf32, #tpu.memory_space<vmem>>, vector<1x8x256xf32>,
    } else {
    }
    return
  }
  func.func @transform_0(%arg0: i32, %arg1: i32) -> (i32, i32, i32) {
    %c0_i32 = arith.constant 0 : i32
    %c0_i32_0 = arith.constant 0 : i32
    %c0_i32_1 = arith.constant 0 : i32
    return %arg1, %c0_i32, %c0_i32_0 : i32, i32, i32
  }
  func.func @transform_1(%arg0: i32, %arg1: i32) -> (i32, i32, i32) {
    %c0_i32 = arith.constant 0 : i32
    %c0_i32_0 = arith.constant 0 : i32
    %c0_i32_1 = arith.constant 0 : i32
    %c0_i32_2 = arith.constant 0 : i32
    return %c0_i32, %c0_i32_0, %c0_i32_1 : i32, i32, i32
  }
  func.func @transform_2(%arg0: i32, %arg1: i32) -> (i32, i32) {
    %c0_i32 = arith.constant 0 : i32
    %c0_i32_0 = arith.constant 0 : i32
    %c0_i32_1 = arith.constant 0 : i32
    return %c0_i32, %c0_i32_0 : i32, i32
  }
  func.func @transform_3(%arg0: i32, %arg1: i32) -> (i32, i32) {
    %c0_i32 = arith.constant 0 : i32
    %c0_i32_0 = arith.constant 0 : i32
    %c0_i32_1 = arith.constant 0 : i32
    return %c0_i32, %c0_i32_0 : i32, i32
  }
  func.func @transform_4(%arg0: i32, %arg1: i32) -> (i32, i32, i32) {
    %0 = arith.muli %arg0, %arg1 : i32
    %c0_i32 = arith.constant 0 : i32
    %c0_i32_0 = arith.constant 0 : i32
    %c0_i32_1 = arith.constant 0 : i32
    return %0, %c0_i32, %c0_i32_0 : i32, i32, i32
  }
}

</mosaic_0001>

<bundles_post_ra>
// kernel: basic_block_forward.1
= control target key start
LH: loop header
LB: loop body
LE: loop exit
PB: predicated region body
PF: predicated region fallthrough
CT: control target
= control target key end

     0   :  { %s1069_s15 = smov 0   ;;  %s1071_s16 = smov 0   ;;  %s1287_s0 = inlined_call_operand.vmem [shape: bf16[2,4,290], index: 0, kind: input, shape index: {}]   ;;  %s1288_s1 = inlined_call_operand.vmem [shape: bf16[9,8,4], index: 1, kind: input, shape index: {}]   ;;  %s1289_s2 = inlined_call_operand.vmem [shape: f32[8,1], index: 2, kind: input, shape index: {}]   ;;  %s1290_s3 = inlined_call_operand.vmem [shape: f32[8,1], index: 3, kind: input, shape index: {}]   ;;  %s1291_s4 = inlined_call_operand.vmem [shape: f32[2,8,256], index: 4, kind: output, shape index: {}]  }
   0x1   :  { %s1073_s17 = smov 0   ;;  %s1075_s18 = smov 0  }
   0x2   :  { %s1077_s19 = smov 0  }
   0x3 LB: > { %s23_s20 = sadd.s32 1, %s1024_s17  ;;  %s26_s21 = sadd.s32 1, %s1028_s18  ;;  %s1032_s19 = sphi %s1077_s19, %s14_s19   ;;  %s1028_s18 = sphi %s1075_s18, %s1304_s18   ;;  %s1024_s17 = sphi %s1073_s17, %s1303_s17   ;;  %s1020_s16 = sphi %s1071_s16, %s1302_s16   ;;  %s1016_s15 = sphi %s1069_s15, %s1301_s15  }
   0x4   : > { %p24_p0 = scmp.ge.s32.totalorder %s23_s20, 2  ;;  %p905_p1 = scmp.ge.s32.totalorder %s1032_s19, 1 }
   0x5   : > { %p176_p2 = scmp.lt.s32.totalorder %s1032_s19, 5 }
   0x6   : > { %s1306_s20 = smov (%p24_p0, %s23_s20), 0  ;;  %s1308_s21 = smov (!%p24_p0, %s26_s21), %s1028_s18 }
   0x7   : > { %p177_p3 = pnand %p905_p1, %p176_p2  ;;  %p28_p4 = scmp.ge.s32.totalorder %s1308_s21, 2 }
   0x8   : > { %p203_p5 = scmp.lt.s32.totalorder (!%p177_p3), %s1016_s15, 1  ;;  %s208_s27 = smul.u32 (!%p177_p3), %s1016_s15, %s1020_s16 }
   0x9   : > { %s1310_s21 = smov (%p28_p4, %s1308_s21), 0  ;;  %180 = sbr.rel (%p177_p3) target bundleno = 674 (0x2a2), region = 36 }
   0xa   : > { %p209_p6 = scmp.lt.s32.totalorder (!%p177_p3), %s208_s27, 1  ;;  %s1034_s6 = smov (!%p177_p3), 127  }
   0xb   : > { %s1035_s7 = smov (!%p177_p3), 126   ;;  %s1036_s8 = smov (!%p177_p3), 112  }
   0xc   : > { %s1037_s9 = smov (!%p177_p3), 111   ;;  %s1038_s10 = smov (!%p177_p3), 110  }
   0xd   : > { %s1039_s11 = smov (!%p177_p3), 96   ;;  %s1040_s12 = smov (!%p177_p3), 95  }
   0xe   : > { %s204_s22 = scalar_select %p203_p5, %s1016_s15, 1  ;;  %vm257_vm0 = vcmask 1041408   ;;  %v248_v29 = vld [vmem:[%s1288_s1] sm:$0xf]  ;;  %vm253_vm1 = vcmask 31744   ;;  %vm366_vm2 = vcmask 1031168  }
   0xf   : > { %s1312_s27 = smov (!%p209_p6, %s208_s27), 1  ;;  %s1041_s13 = smov 94   ;;  %v914_v34 = vld [vmem:[%s1288_s1 + $0x8] sm:$0xf]  ;;  %vm311_vm3 = vcmask 1039360   ;;  %vm427_vm4 = vcmask 916480  }
  0x10   : > { %s940_s23 = smul.u32 6, %s204_s22  ;;  %s939_s28 = sshll.u32 %s1312_s27, 4  ;;  %v911_v45 = vld [vmem:[%s1288_s1 + $0x4] sm:$0xf]  ;;  %vm484_vm5 = vcmask 908288   ;;  %vm539_vm6 = vcmask 900096  }
  0x11   : > { %s1121_s5 = scalar_lea.vmem %s1291_s4, %s939_s28  ;;  %v917_v55 = vld [vmem:[%s1288_s1 + $0xc] sm:$0xf]  ;;  %v920_v61 = vld [vmem:[%s1288_s1 + $0x10] sm:$0xf]  ;;  %vm596_vm7 = vcmask 785408   ;;  %vm653_vm8 = vcmask 777216  }
  0x12   : > { %s207_s26 = scalar_lea.vmem %s1287_s0, %s940_s23  ;;  %vm708_vm9 = vcmask 769024   ;;  %p750_p7 = scmp.eq.s32.totalorder %s1020_s16, 0 }
  0x13   : > { %v1108_v0 = vld [vmem:[%s207_s26] sm:$0x3f]  ;;  %p751_p8 = scmp.eq.s32.totalorder %s1016_s15, 0 }
  0x14   : > { %250 = vst [vmem:[#allocation1] ss:$4 sm:$0xff] %v1108_v0 }
  0x15   : > { %p1201_p9 = pnand %p751_p8, %p750_p7 }
  0x1b   : > { %v1113_v1 = vld.sshfl [vmem:[#allocation1] sm:$0xff pattern:$0x73625140]  ;;  %v1115_v2 = vld.sshfl [vmem:[#allocation1 + $0x8] sm:$0xff pattern:$0x73625140] }
  0x1c   : > { %298 = vst [vmem:[#allocation1] ss:$4 sm:$0xff] %v1108_v0  ;;  %v260_v27 = vsel %vm257_vm0, %v1115_v2, 0  ;;  %v258_v28 = vsel %vm257_vm0, %v1113_v1, 0 }
  0x1d   : > { %282 = vmatpush.bf16.msra.mxu1 %v260_v27  ;;  %269 = vmatpush.bf16.msra.mxu0 %v258_v28 }
  0x20   : > { %910 = vmatmul.msk.bf16.vlgmr.msra.gmra.mxu1 %vm253_vm1, %v248_v29  ;;  %909 = vmatmul.msk.bf16.vlgmr.msra.gmra.mxu0 %vm253_vm1, %v248_v29  ;;  %v932_v29 = vld [vmem:[%s1288_s1 + $0x20] sm:$0xf] }
  0x23   : > { %v303_v3 = vld.sshfl [vmem:[#allocation1 + $0x10] sm:$0xff pattern:$0x73625140]  ;;  %v299_v4 = vld.sshfl [vmem:[#allocation1] sm:$0xff pattern:$0x73625140] }
  0x24   : > { %309 = vrot.lane.b32.xlu1 %v303_v3, %s1034_s6  ;;  %305 = vrot.lane.b32.xlu0 %v299_v4, %s1034_s6  ;;  %v301_v5 = vld.sshfl [vmem:[#allocation1 + $0x8] sm:$0xff pattern:$0x73625140] }
  0x25   : > { %353 = vst [vmem:[#allocation1] ss:$4 sm:$0xff] %v1108_v0 }
  0x2c   : > { %307 = vrot.lane.b32.xlu0 %v301_v5, %s1034_s6  ;;  %v354_v6 = vld.sshfl [vmem:[#allocation1] sm:$0xff pattern:$0x73625140]  ;;  %v356_v7 = vld.sshfl [vmem:[#allocation1 + $0x8] sm:$0xff pattern:$0x73625140] }
  0x2d   : > { %360 = vrot.lane.b32.xlu1 %v354_v6, %s1035_s7  ;;  %v358_v8 = vld.sshfl [vmem:[#allocation1 + $0x10] sm:$0xff pattern:$0x73625140]  ;;  %362 = vrot.lane.b32.xlu2 %v356_v7, %s1035_s7 }
  0x2e   : > { %414 = vst [vmem:[#allocation1] ss:$4 sm:$0xff] %v1108_v0  ;;  %v923_v6 = vld [vmem:[%s1288_s1 + $0x14] sm:$0xf] }
  0x35   : > { %v419_v9 = vld.sshfl [vmem:[#allocation1 + $0x10] sm:$0xff pattern:$0x73625140]  ;;  %v417_v10 = vld.sshfl [vmem:[#allocation1 + $0x8] sm:$0xff pattern:$0x73625140]  ;;  %364 = vrot.lane.b32.xlu2 %v358_v8, %s1035_s7 }
  0x36   : > { %423 = vrot.lane.b32.xlu1 %v417_v10, %s1036_s8  ;;  %v415_v11 = vld.sshfl [vmem:[#allocation1] sm:$0xff pattern:$0x73625140] }
  0x37   : > { %421 = vrot.lane.b32.xlu0 %v415_v11, %s1036_s8  ;;  %471 = vst [vmem:[#allocation1] ss:$4 sm:$0xff] %v1108_v0 }
  0x3d   : > { %425 = vrot.lane.b32.xlu2 %v419_v9, %s1036_s8 }
  0x3e   : > { %v474_v12 = vld.sshfl [vmem:[#allocation1 + $0x8] sm:$0xff pattern:$0x73625140]  ;;  %v476_v13 = vld.sshfl [vmem:[#allocation1 + $0x10] sm:$0xff pattern:$0x73625140] }
  0x3f   : > { %480 = vrot.lane.b32.xlu1 %v474_v12, %s1037_s9  ;;  %v472_v14 = vld.sshfl [vmem:[#allocation1] sm:$0xff pattern:$0x73625140] }
  0x40   : > { %478 = vrot.lane.b32.xlu0 %v472_v14, %s1037_s9  ;;  %526 = vst [vmem:[#allocation1] ss:$4 sm:$0xff] %v1108_v0 }
  0x45   : > { %482 = vrot.lane.b32.xlu2 %v476_v13, %s1037_s9  ;;  %v926_v13 = vld [vmem:[%s1288_s1 + $0x18] sm:$0xf] }
  0x47   : > { %v529_v15 = vld.sshfl [vmem:[#allocation1 + $0x8] sm:$0xff pattern:$0x73625140]  ;;  %v531_v16 = vld.sshfl [vmem:[#allocation1 + $0x10] sm:$0xff pattern:$0x73625140] }
  0x48   : > { %535 = vrot.lane.b32.xlu1 %v529_v15, %s1038_s10  ;;  %v527_v17 = vld.sshfl [vmem:[#allocation1] sm:$0xff pattern:$0x73625140] }
  0x49   : > { %533 = vrot.lane.b32.xlu0 %v527_v17, %s1038_s10  ;;  %583 = vst [vmem:[#allocation1] ss:$4 sm:$0xff] %v1108_v0 }
  0x4d   : > { %537 = vrot.lane.b32.xlu2 %v531_v16, %s1038_s10 }
  0x50   : > { %v586_v18 = vld.sshfl [vmem:[#allocation1 + $0x8] sm:$0xff pattern:$0x73625140]  ;;  %v588_v19 = vld.sshfl [vmem:[#allocation1 + $0x10] sm:$0xff pattern:$0x73625140] }
  0x51   : > { %592 = vrot.lane.b32.xlu1 %v586_v18, %s1039_s11  ;;  %v584_v20 = vld.sshfl [vmem:[#allocation1] sm:$0xff pattern:$0x73625140] }
  0x52   : > { %590 = vrot.lane.b32.xlu0 %v584_v20, %s1039_s11  ;;  %640 = vst [vmem:[#allocation1] ss:$4 sm:$0xff] %v1108_v0 }
  0x55   : > { %594 = vrot.lane.b32.xlu2 %v588_v19, %s1039_s11 }
  0x59   : > { %v643_v21 = vld.sshfl [vmem:[#allocation1 + $0x8] sm:$0xff pattern:$0x73625140]  ;;  %v645_v22 = vld.sshfl [vmem:[#allocation1 + $0x10] sm:$0xff pattern:$0x73625140] }
  0x5a   : > { %649 = vrot.lane.b32.xlu1 %v643_v21, %s1040_s12  ;;  %v641_v23 = vld.sshfl [vmem:[#allocation1] sm:$0xff pattern:$0x73625140]  ;;  %v929_v21 = vld [vmem:[%s1288_s1 + $0x1c] sm:$0xf] }
  0x5b   : > { %647 = vrot.lane.b32.xlu0 %v641_v23, %s1040_s12  ;;  %695 = vst [vmem:[#allocation1] ss:$4 sm:$0xff] %v1108_v0 }
  0x5d   : > { %651 = vrot.lane.b32.xlu2 %v645_v22, %s1040_s12 }
  0x62   : > { %v698_v24 = vld.sshfl [vmem:[#allocation1 + $0x8] sm:$0xff pattern:$0x73625140]  ;;  %v696_v25 = vld.sshfl [vmem:[#allocation1] sm:$0xff pattern:$0x73625140] }
  0x63   : > { %704 = vrot.lane.b32.xlu1 %v698_v24, %s1041_s13  ;;  %702 = vrot.lane.b32.xlu0 %v696_v25, %s1041_s13  ;;  %v700_v26 = vld.sshfl [vmem:[#allocation1 + $0x10] sm:$0xff pattern:$0x73625140] }
  0x65   : > { %706 = vrot.lane.b32.xlu2 %v700_v26, %s1041_s13 }
  0x87   : > { %v363_v30 = vpop.permute.xlu2 %362 }
  0x8f   : > { %v365_v31 = vpop.permute.xlu2 %364 }
  0x90   : > { %v368_v32 = vsel %vm366_vm2, %v363_v30, %v365_v31 }
  0x91   : > { %v376_v33 = vsel %vm257_vm0, %v368_v32, 0 }
  0x92   : > { %398 = vmatpush.bf16.msrb.mxu1 %v376_v33 }
  0x95   : > { %916 = vmatmul.msk.bf16.vlgmr.msrb.gmra.mxu1 %vm253_vm1, %v914_v34 }
  0x96   : > { %v310_v35 = vpop.permute.xlu1 %309  ;;  %v306_v36 = vpop.permute.xlu0 %305 }
  0x97   : > { %v426_v46 = vpop.permute.xlu2 %425 }
  0x9d   : > { %v271_v31 = vpop.f32.mrf.mxu0 }
  0x9e   : > { %v308_v37 = vpop.permute.xlu0 %307 }
  0x9f   : > { %v361_v38 = vpop.permute.xlu1 %360  ;;  %v312_v39 = vsel %vm311_vm3, %v306_v36, %v308_v37  ;;  %v313_v40 = vsel %vm311_vm3, %v308_v37, %v310_v35  ;;  %v483_v53 = vpop.permute.xlu2 %482  ;;  %v217_v35 = vlaneseq }
  0xa0   : > { %v318_v41 = vsel %vm257_vm0, %v312_v39, 0  ;;  %v321_v42 = vsel %vm257_vm0, %v313_v40, 0  ;;  %v367_v43 = vsel %vm366_vm2, %v361_v38, %v363_v30  ;;  %v284_v30 = vpop.f32.mrf.mxu1 }
  0xa1   : > { %330 = vmatpush.bf16.msra.mxu2 %v318_v41  ;;  %343 = vmatpush.bf16.msra.mxu3 %v321_v42  ;;  %v373_v44 = vsel %vm257_vm0, %v367_v43, 0  ;;  %v218_v36 = vand.u32 127, %v217_v35 }
  0xa2   : > { %385 = vmatpush.bf16.msrb.mxu0 %v373_v44 }
  0xa3   : > { %v219_v38 = vadd.s32 128, %v218_v36 }
  0xa4   : > { %912 = vmatmul.msk.bf16.vlgmr.msra.gmra.mxu2 %vm253_vm1, %v911_v45  ;;  %913 = vmatmul.msk.bf16.vlgmr.msra.gmra.mxu3 %vm253_vm1, %v911_v45 }
  0xa5   : > { %915 = vmatmul.msk.bf16.vlgmr.msrb.gmra.mxu0 %vm253_vm1, %v914_v34  ;;  %v273_v33 = vpop.f32.mrf.mxu0  ;;  %v231_v39 = vand.u32 15, %v219_v38 }
  0xa7   : > { %v538_v62 = vpop.permute.xlu2 %537  ;;  %vm1205_vm10 = vcmp.ne.s32.totalorder %v231_v39, 0  ;;  %vm1209_vm11 = vcmp.ne.s32.totalorder %v231_v39, 15 }
  0xa8   : > { %v424_v47 = vpop.permute.xlu1 %423  ;;  %v286_v32 = vpop.f32.mrf.mxu1  ;;  %v293_v43 = vsel %vm1205_vm10, %v284_v30, 0.0 }
  0xa9   : > { %v422_v48 = vpop.permute.xlu0 %421  ;;  %v429_v49 = vsel %vm427_vm4, %v424_v47, %v426_v46 }
  0xaa   : > { %v428_v50 = vsel %vm427_vm4, %v422_v48, %v424_v47  ;;  %v437_v51 = vsel %vm257_vm0, %v429_v49, 0 }
  0xab   : > { %v434_v52 = vsel %vm257_vm0, %v428_v50, 0  ;;  %459 = vmatpush.bf16.msrb.mxu3 %v437_v51 }
  0xac   : > { %446 = vmatpush.bf16.msrb.mxu2 %v434_v52 }
  0xaf   : > { %v595_v5 = vpop.permute.xlu2 %594 }
  0xb1   : > { %v481_v54 = vpop.permute.xlu1 %480 }
  0xb2   : > { %v486_v56 = vsel %vm484_vm5, %v481_v54, %v483_v53  ;;  %v479_v57 = vpop.permute.xlu0 %478 }
  0xb3   : > { %v494_v58 = vsel %vm257_vm0, %v486_v56, 0  ;;  %v485_v59 = vsel %vm484_vm5, %v479_v57, %v481_v54 }
  0xb4   : > { %v491_v60 = vsel %vm257_vm0, %v485_v59, 0  ;;  %516 = vmatpush.bf16.msra.mxu1 %v494_v58  ;;  %918 = vmatmul.msk.bf16.vlgmr.msrb.gmra.mxu2 %vm253_vm1, %v917_v55  ;;  %v224_v58 = vand.u32 15, %v218_v36 }
  0xb5   : > { %503 = vmatpush.bf16.msra.mxu0 %v491_v60  ;;  %919 = vmatmul.msk.bf16.vlgmr.msrb.gmra.mxu3 %vm253_vm1, %v917_v55 }
  0xb6   : > { %vm1217_vm12 = vcmp.ne.s32.totalorder %v224_v58, 0  ;;  %vm1221_vm13 = vcmp.ne.s32.totalorder %v224_v58, 15 }
  0xb7   : > { %922 = vmatmul.msk.bf16.vlgmr.msra.gmra.mxu1 %vm253_vm1, %v920_v61  ;;  %v652_v14 = vpop.permute.xlu2 %651 }
  0xb8   : > { %921 = vmatmul.msk.bf16.vlgmr.msra.gmra.mxu0 %vm253_vm1, %v920_v61 }
  0xba   : > { %v536_v63 = vpop.permute.xlu1 %535 }
  0xbb   : > { %v541_v0 = vsel %vm539_vm6, %v536_v63, %v538_v62  ;;  %v534_v1 = vpop.permute.xlu0 %533 }
  0xbc   : > { %v549_v2 = vsel %vm257_vm0, %v541_v0, 0  ;;  %v540_v3 = vsel %vm539_vm6, %v534_v1, %v536_v63  ;;  %v292_v63 = vsel %vm1217_vm12, %v271_v31, 0.0 }
  0xbd   : > { %v546_v4 = vsel %vm257_vm0, %v540_v3, 0  ;;  %571 = vmatpush.bf16.msra.mxu3 %v549_v2 }
  0xbe   : > { %558 = vmatpush.bf16.msra.mxu2 %v546_v4 }
  0xbf   : > { %v707_v22 = vpop.permute.xlu2 %706 }
  0xc3   : > { %v593_v7 = vpop.permute.xlu1 %592 }
  0xc4   : > { %v598_v8 = vsel %vm596_vm7, %v593_v7, %v595_v5  ;;  %v591_v9 = vpop.permute.xlu0 %590  ;;  %924 = vmatmul.msk.bf16.vlgmr.msra.gmra.mxu2 %vm253_vm1, %v923_v6 }
  0xc5   : > { %v606_v10 = vsel %vm257_vm0, %v598_v8, 0  ;;  %v597_v11 = vsel %vm596_vm7, %v591_v9, %v593_v7  ;;  %925 = vmatmul.msk.bf16.vlgmr.msra.gmra.mxu3 %vm253_vm1, %v923_v6 }
  0xc6   : > { %v603_v12 = vsel %vm257_vm0, %v597_v11, 0  ;;  %628 = vmatpush.bf16.msrb.mxu1 %v606_v10 }
  0xc7   : > { %615 = vmatpush.bf16.msrb.mxu0 %v603_v12 }
  0xc9   : > { %928 = vmatmul.msk.bf16.vlgmr.msrb.gmra.mxu1 %vm253_vm1, %v926_v13 }
  0xca   : > { %927 = vmatmul.msk.bf16.vlgmr.msrb.gmra.mxu0 %vm253_vm1, %v926_v13 }
  0xcc   : > { %v650_v15 = vpop.permute.xlu1 %649 }
  0xcd   : > { %v655_v16 = vsel %vm653_vm8, %v650_v15, %v652_v14  ;;  %v648_v17 = vpop.permute.xlu0 %647 }
  0xce   : > { %v663_v18 = vsel %vm257_vm0, %v655_v16, 0  ;;  %v654_v19 = vsel %vm653_vm8, %v648_v17, %v650_v15 }
  0xcf   : > { %v660_v20 = vsel %vm257_vm0, %v654_v19, 0  ;;  %685 = vmatpush.bf16.msrb.mxu3 %v663_v18 }
  0xd0   : > { %672 = vmatpush.bf16.msrb.mxu2 %v660_v20 }
  0xd4   : > { %930 = vmatmul.msk.bf16.vlgmr.msrb.gmra.mxu2 %vm253_vm1, %v929_v21 }
  0xd5   : > { %v705_v23 = vpop.permute.xlu1 %704  ;;  %v703_v24 = vpop.permute.xlu0 %702  ;;  %931 = vmatmul.msk.bf16.vlgmr.msrb.gmra.mxu3 %vm253_vm1, %v929_v21 }
  0xd6   : > { %v710_v25 = vsel %vm708_vm9, %v705_v23, %v707_v22  ;;  %v709_v26 = vsel %vm708_vm9, %v703_v24, %v705_v23 }
  0xd7   : > { %v718_v27 = vsel %vm257_vm0, %v710_v25, 0  ;;  %v715_v28 = vsel %vm257_vm0, %v709_v26, 0 }
  0xd8   : > { %727 = vmatpush.bf16.msra.mxu0 %v715_v28  ;;  %740 = vmatpush.bf16.msra.mxu1 %v718_v27 }
  0xdb   : > { %933 = vmatmul.msk.bf16.vlgmr.msra.gmra.mxu0 %vm253_vm1, %v932_v29  ;;  %934 = vmatmul.msk.bf16.vlgmr.msra.gmra.mxu1 %vm253_vm1, %v932_v29 }
 0x112   : > { %v400_v34 = vpop.f32.mrf.mxu1 }
 0x113   : > { %v409_v44 = vsel %vm1209_vm11, %v400_v34, 0.0 }
 0x11a   : > { %v402_v37 = vpop.f32.mrf.mxu1 }
 0x122   : > { %v387_v40 = vpop.f32.mrf.mxu0 }
 0x123   : > { %v408_v2 = vsel %vm1221_vm13, %v387_v40, 0.0 }
 0x127   : > { %v332_v45 = vpop.f32.mrf.mxu2  ;;  %v345_v46 = vpop.f32.mrf.mxu3 }
 0x128   : > { %v350_v47 = vadd.f32 %v345_v46, %v293_v43  ;;  %v349_v0 = vadd.f32 %v332_v45, %v292_v63 }
 0x12a   : > { %v411_v48 = vadd.f32 %v409_v44, %v350_v47  ;;  %v389_v49 = vpop.f32.mrf.mxu0  ;;  %v410_v7 = vadd.f32 %v408_v2, %v349_v0 }
 0x12f   : > { %v334_v50 = vpop.f32.mrf.mxu2  ;;  %v347_v51 = vpop.f32.mrf.mxu3 }
 0x134   : > { %v518_v52 = vpop.f32.mrf.mxu1 }
 0x135   : > { %v505_v53 = vpop.f32.mrf.mxu0 }
 0x137   : > { %v448_v54 = vpop.f32.mrf.mxu2 }
 0x138   : > { %v461_v55 = vpop.f32.mrf.mxu3  ;;  %v465_v6 = vsel %vm1217_vm12, %v448_v54, 0.0 }
 0x139   : > { %v466_v8 = vsel %vm1205_vm10, %v461_v55, 0.0  ;;  %v467_v9 = vadd.f32 %v465_v6, %v410_v7 }
 0x13a   : > { %v468_v10 = vadd.f32 %v466_v8, %v411_v48 }
 0x13b   : > { %v522_v15 = vadd.f32 %v505_v53, %v467_v9 }
 0x13c   : > { %v520_v56 = vpop.f32.mrf.mxu1  ;;  %v523_v19 = vadd.f32 %v518_v52, %v468_v10 }
 0x13d   : > { %v507_v57 = vpop.f32.mrf.mxu0 }
 0x13f   : > { %v450_v59 = vpop.f32.mrf.mxu2 }
 0x140   : > { %v463_v60 = vpop.f32.mrf.mxu3 }
 0x146   : > { %v630_v1 = vpop.f32.mrf.mxu1 }
 0x147   : > { %v617_v3 = vpop.f32.mrf.mxu0  ;;  %v560_v4 = vpop.f32.mrf.mxu2  ;;  %v635_v23 = vsel %vm1205_vm10, %v630_v1, 0.0 }
 0x148   : > { %v573_v5 = vpop.f32.mrf.mxu3  ;;  %v577_v12 = vsel %vm1221_vm13, %v560_v4, 0.0  ;;  %v634_v21 = vsel %vm1217_vm12, %v617_v3, 0.0 }
 0x149   : > { %v578_v17 = vsel %vm1209_vm11, %v573_v5, 0.0  ;;  %v579_v18 = vadd.f32 %v577_v12, %v522_v15 }
 0x14a   : > { %v580_v20 = vadd.f32 %v578_v17, %v523_v19 }
 0x14b   : > { %v636_v22 = vadd.f32 %v634_v21, %v579_v18 }
 0x14c   : > { %v637_v28 = vadd.f32 %v635_v23, %v580_v20 }
 0x14e   : > { %v632_v11 = vpop.f32.mrf.mxu1 }
 0x14f   : > { %v619_v13 = vpop.f32.mrf.mxu0  ;;  %v562_v14 = vpop.f32.mrf.mxu2 }
 0x150   : > { %v575_v16 = vpop.f32.mrf.mxu3 }
 0x157   : > { %v674_v24 = vpop.f32.mrf.mxu2 }
 0x158   : > { %v729_v25 = vpop.f32.mrf.mxu0  ;;  %v742_v26 = vpop.f32.mrf.mxu1  ;;  %v691_v27 = vadd.f32 %v674_v24, %v636_v22 }
 0x159   : > { %v746_v29 = vsel %vm1221_vm13, %v729_v25, 0.0  ;;  %v747_v30 = vsel %vm1209_vm11, %v742_v26, 0.0  ;;  %v687_v31 = vpop.f32.mrf.mxu3 }
 0x15a   : > { %v1245_v32 = vadd.f32 %v746_v29, %v691_v27  ;;  %v692_v33 = vadd.f32 %v687_v31, %v637_v28 }
 0x15c   : > { %v1247_v34 = vadd.f32 %v747_v30, %v692_v33 }
 0x15d   : > { %755 = sbr.rel (%p1201_p9) target bundleno = 357 (0x165), region = 40 }
 0x15f   : > { %v676_v35 = vpop.f32.mrf.mxu2 }
 0x160   : > { %v731_v36 = vpop.f32.mrf.mxu0  ;;  %v744_v37 = vpop.f32.mrf.mxu1 }
 0x161   : > { %v689_v38 = vpop.f32.mrf.mxu3 }
 0x162   : > { %vm756_vm14 = vcmask 7168   ;;  %v1042_v39 = vmov 0.0  }
 0x163   : > { %757 = vst.msk [vmem:[#allocation2] sm:$0xff] %vm756_vm14, %v1042_v39 }
 0x164   : > { %758 = vst.msk [vmem:[#allocation3] sm:$0xff] %vm756_vm14, %v1042_v39 }
 0x165 PF: > { %p935_p10 = scmp.ne.s32.totalorder %s1020_s16, 0 }
 0x167   : > { %761 = sbr.rel (%p935_p10) target bundleno = 493 (0x1ed), region = 44 }
 0x16c   : > { %v763_v40 = vadd.f32 %v1247_v34, %v1245_v32  ;;  %v770_v41 = vmul.f32 %v1245_v32, %v1245_v32  ;;  %v771_v42 = vmul.f32 %v1247_v34, %v1247_v34  ;;  %v762_v44 = vld [vmem:[#allocation2] sm:$0xff]  ;;  %vm767_vm15 = vcmask 7168   ;;  %v769_v47 = vld [vmem:[#allocation3] sm:$0xff] }
 0x16e   : > { %764 = vadd.xlane.f32.xlu0 %v763_v40  ;;  %v772_v43 = vadd.f32 %v771_v42, %v770_v41 }
 0x176   : > { %773 = vadd.xlane.f32.xlu0 %v772_v43 }
 0x1e1   : > { %v765_v45 = vpop.xlane.xlu0 %764 }
 0x1e2   : > { %v766_v46 = vadd.f32 %v765_v45, %v762_v44 }
 0x1e4   : > { %768 = vst.msk [vmem:[#allocation2] sm:$0xff] %vm767_vm15, %v766_v46 }
 0x1e9   : > { %v774_v48 = vpop.xlane.xlu0 %773 }
 0x1ea   : > { %v775_v49 = vadd.f32 %v774_v48, %v769_v47 }
 0x1ec   : > { %776 = vst.msk [vmem:[#allocation3] sm:$0xff] %vm767_vm15, %v775_v49 }
 0x1ed PF: > { %p777_p11 = scmp.eq.s32.totalorder %s1016_s15, 1 }
 0x1ef   : > { %p778_p12 = pnand %p777_p11, %p750_p7 }
 0x1f1   : > { %781 = sbr.rel (%p778_p12) target bundleno = 536 (0x218), region = 48 }
 0x1f6   : > { %v782_v50 = vld [vmem:[#allocation2] sm:$0xff]  ;;  %v784_v51 = vld [vmem:[#allocation3] sm:$0xff]  ;;  %v799_v63 = vld [vmem:[%s1289_s2] sm:$0xff]  ;;  %vm801_vm3 = vcmask 7168  }
 0x1f7   : > { %v783_v52 = vmul.f32 0.001953125, %v782_v50  ;;  %v785_v53 = vmul.f32 0.001953125, %v784_v51  ;;  %v803_v2 = vld [vmem:[%s1290_s3] sm:$0xff] }
 0x1f9   : > { %v786_v54 = vmul.f32 %v783_v52, %v783_v52 }
 0x1fb   : > { %v787_v55 = vsub.f32 %v785_v53, %v786_v54 }
 0x1fd   : > { %v788_v56 = vadd.f32 1e-05, %v787_v55 }
 0x1ff   : > { %991 = vrsqrt.f32 %v788_v56  ;;  %vm795_vm0 = vweird.f32 %v788_v56 }
 0x205   : > { %v992_v57 = vpop.eup %991 }
 0x206   : > { %v790_v58 = vmul.f32 %v992_v57, %v788_v56  ;;  %vm796_vm1 = vweird.f32 %v992_v57 }
 0x207   : > { %vm797_vm2 = vmor %vm795_vm0, %vm796_vm1 }
 0x208   : > { %v791_v59 = vmul.f32 %v992_v57, %v790_v58 }
 0x20a   : > { %v792_v60 = vmul.f32 0.5, %v791_v59 }
 0x20c   : > { %v793_v61 = vsub.f32 1.5, %v792_v60 }
 0x20e   : > { %v794_v62 = vmul.f32 %v992_v57, %v793_v61 }
 0x210   : > { %v798_v0 = vsel %vm797_vm2, %v992_v57, %v794_v62 }
 0x211   : > { %v800_v1 = vmul.f32 %v799_v63, %v798_v0 }
 0x213   : > { %802 = vst.msk [vmem:[#allocation2] sm:$0xff] %vm801_vm3, %v800_v1  ;;  %v804_v3 = vmul.f32 %v800_v1, %v783_v52 }
 0x215   : > { %v805_v4 = vsub.f32 %v803_v2, %v804_v3 }
 0x217   : > { %806 = vst.msk [vmem:[#allocation3] sm:$0xff] %vm801_vm3, %v805_v4 }
 0x218 PF: > { %p936_p13 = scmp.ne.s32.totalorder %s1020_s16, 1 }
 0x21a   : > { %810 = sbr.rel (%p936_p13) target bundleno = 674 (0x2a2), region = 52 }
 0x21f   : > { %v811_v5 = vld [vmem:[#allocation2] sm:$0xff]  ;;  %v1043_v6 = vmov 0   ;;  %v819_v7 = vld [vmem:[#allocation3] sm:$0xff] }
 0x220   : > { %993 = vset.pattern.permute.xlu0 %v1043_v6 }
 0x221   : > { %814 = vperm.xlu0 %993, %v811_v5  }
 0x229   : > { %822 = vperm.xlu0 %993, %v819_v7  }
 0x293   : > { %v815_v8 = vpop.permute.xlu0 %814 }
 0x294   : > { %v817_v9 = vmul.f32 %v815_v8, %v1245_v32  ;;  %v818_v10 = vmul.f32 %v815_v8, %v1247_v34 }
 0x29b   : > { %v823_v11 = vpop.permute.xlu0 %822 }
 0x29c   : > { %v825_v12 = vadd.f32 %v823_v11, %v817_v9  ;;  %v826_v13 = vadd.f32 %v823_v11, %v818_v10 }
 0x29e   : > { %v827_v14 = vmax.f32 %v825_v12, 0.0  ;;  %v828_v15 = vmax.f32 %v826_v13, 0.0 }
 0x2a0   : > { %829 = vst [vmem:[%s1121_s5] sm:$0xff] %v827_v14 }
 0x2a1   : > { %830 = vst [vmem:[%s1121_s5 + $0x8] sm:$0xff] %v828_v15 }
 0x2a2 PF: > { %s14_s19 = sadd.s32 1, %s1032_s19   ;;  %s1301_s15 = smov %s1024_s17 }
 0x2a3   : > { %p11_p0 = scmp.ge.s32.totalorder %s14_s19, 6   ;;  %s1302_s16 = smov %s1028_s18 }
 0x2a4   : > { %s1303_s17 = smov %s1306_s20  ;;  %s1304_s18 = smov %s1310_s21 }
 0x2a5   :  { %13 = sbr.rel (!%p11_p0) target bundleno = 3 (0x3), region = 90 }

</bundles_post_ra>
